<compile_context>
chip_gen: v7x
topology: tpu7x:2x2x1
jax: 0.10.0
libtpu: 0.0.40
codegen_flags: <defaults>
</compile_context>

<pallas_src>
import jax
import jax.numpy as jnp
from jax.experimental import pallas as pl
from jax.experimental.pallas import tpu as pltpu


def _round_up(x, m):
    return ((x + m - 1) // m) * m


def _hand_shape_kernel(x_ref, w_ref, b_ref, out_ref, acc_ref):
    # x_ref: (b_tile, tk)      w_ref: (tk, L_pad)      b_ref: (1, L_pad) f32
    # out_ref: (b_tile, L_pad) acc_ref: (b_tile, L_pad) f32 scratch
    k = pl.program_id(1)

    @pl.when(k == 0)
    def _():
        acc_ref[...] = jnp.zeros_like(acc_ref)

    acc_ref[...] += jnp.dot(
        x_ref[...], w_ref[...], preferred_element_type=jnp.float32
    )

    @pl.when(k == pl.num_programs(1) - 1)
    def _():
        out_ref[...] = (acc_ref[...] + b_ref[...]).astype(out_ref.dtype)


def _vmem_capacity_bytes():
    try:
        return int(pltpu.get_tpu_info().vmem_capacity_bytes)
    except Exception:
        return 128 * 1024 * 1024


def _num_tensorcores_per_chip():
    try:
        info = pltpu.get_tpu_info()
    except Exception:
        return 1
    for name in ("tensorcores_per_chip", "num_tensorcores"):
        val = getattr(info, name, None)
        if isinstance(val, int) and val > 0:
            return val
    return 1


def hand_shape_process(shape, weight, bias, *, b_tile=None):
    """Pallas equivalent of HandShapeProcess.forward.

    shape:  (B, S, shape_dim)
    weight: (latent_dim, shape_dim)   (PyTorch nn.Linear convention)
    bias:   (latent_dim,)
    returns (1, B, latent_dim)
    """
    B, S, D = shape.shape
    L = weight.shape[0]
    K = S * D
    L_pad = _round_up(L, 128)

    in_dtype = shape.dtype
    out_dtype = in_dtype if jnp.issubdtype(in_dtype, jnp.floating) else jnp.float32
    it_in = jnp.dtype(in_dtype).itemsize
    it_out = jnp.dtype(out_dtype).itemsize
    it_w = it_in

    # Fold the 1/S mean into a replicated weight: W_rep[s*D + d, l] = W[l, d] / S,
    # so x_flat @ W_rep == mean(shape, axis=1) @ W.T.  Built once in the wrapper,
    # pre-oriented (K, L_pad) and pre-cast to the matmul operand dtype.
    w_rep = jnp.tile(jnp.transpose(weight) * (1.0 / S), (S, 1))        # (K, L)
    w_rep = jnp.pad(w_rep, ((0, 0), (0, L_pad - L))).astype(in_dtype)   # (K, L_pad)
    b_p = jnp.pad(bias.astype(jnp.float32), (0, L_pad - L)).reshape(1, L_pad)

    x_flat = shape.reshape(B, K)   # contiguous -> layout no-op, lane-dense K axis

    # ---- generation-aware VMEM budget --------------------------------------
    vmem_cap = _vmem_capacity_bytes()                 # 64 MiB v7x, 128 MiB v5e/v6e
    vmem_limit = min((vmem_cap * 3) // 4, 96 * 1024 * 1024)

    # K tiling: keep the (tk, L_pad) weight block (x2 buffers) within ~1/4 of it.
    w_budget = vmem_limit // 4
    if K * L_pad * it_w * 2 <= w_budget:
        tk, n_k = K, 1
    else:
        tk = max(128, ((w_budget // (2 * L_pad * it_w)) // 128) * 128)
        K_pad = _round_up(K, tk)
        n_k = K_pad // tk
        if K_pad != K:   # zero-padded K columns/rows contribute nothing to the dot
            x_flat = jnp.pad(x_flat, ((0, 0), (0, K_pad - K)))
            w_rep = jnp.pad(w_rep, ((0, K_pad - K), (0, 0)))

    # Batch tile from the true (padded-layout) per-row VMEM cost:
    # double-buffered input + output blocks, plus the f32 accumulator.
    if b_tile is None:
        row_bytes = tk * it_in * 2 + L_pad * it_out * 2 + L_pad * 4
        budget = (vmem_limit * 3) // 5 - tk * L_pad * it_w * 2 - 2 * L_pad * 4
        budget = max(budget, 8 * row_bytes)
        b_tile = min(budget // row_bytes, 4096)
    b_tile = int(min(b_tile, B))
    if b_tile < B:
        b_tile = max(8, (b_tile // 8) * 8)   # sublane-aligned when not full-extent
        b_tile = min(b_tile, B)
    n_b = pl.cdiv(B, b_tile)

    # Batch axis across both TensorCores on 2-TC chips (v7x); otherwise the
    # usual megacore "parallel" hint.  Reduction (K) axis stays last/arbitrary.
    n_tc = _num_tensorcores_per_chip()
    if n_tc == 2 and n_b >= 2:
        batch_sem = pltpu.CORE_PARALLEL
    else:
        batch_sem = pltpu.PARALLEL

    out_p = pl.pallas_call(
        _hand_shape_kernel,
        out_shape=jax.ShapeDtypeStruct((B, L_pad), out_dtype),
        grid=(n_b, n_k),
        in_specs=[
            pl.BlockSpec((b_tile, tk), lambda i, k: (i, k)),
            pl.BlockSpec((tk, L_pad), lambda i, k: (k, 0)),
            pl.BlockSpec((1, L_pad), lambda i, k: (0, 0)),
        ],
        out_specs=pl.BlockSpec((b_tile, L_pad), lambda i, k: (i, 0)),
        scratch_shapes=[pltpu.VMEM((b_tile, L_pad), jnp.float32)],
        compiler_params=pltpu.CompilerParams(
            dimension_semantics=(batch_sem, pltpu.ARBITRARY),
            vmem_limit_bytes=int(vmem_limit),
        ),
    )(x_flat, w_rep, b_p)

    out = out_p[:, :L]
    # res = res.unsqueeze(0)
    return out[None, :, :]


if __name__ == "__main__":
    # Small, deterministic example consistent with the module's forward:
    # shape: (batch=2, seq=8, shape_dim=16), latent_dim=32
    B, S, SHAPE_DIM, LATENT_DIM = 2, 8, 16, 32

    key = jax.random.PRNGKey(0)
    k_shape, k_w, k_b = jax.random.split(key, 3)

    shape_in = jax.random.normal(k_shape, (B, S, SHAPE_DIM), dtype=jnp.float32)
    # Deterministic "nn.Linear"-style parameters (synthetic, not a checkpoint).
    bound = 1.0 / jnp.sqrt(SHAPE_DIM)
    weight = jax.random.uniform(
        k_w, (LATENT_DIM, SHAPE_DIM), dtype=jnp.float32, minval=-bound, maxval=bound
    )
    bias = jax.random.uniform(
        k_b, (LATENT_DIM,), dtype=jnp.float32, minval=-bound, maxval=bound
    )

    res = hand_shape_process(shape_in, weight, bias)
    jax.block_until_ready(res)

    # Reference check in plain JAX (same math as the PyTorch module).
    ref = (jnp.mean(shape_in, axis=1) @ weight.T + bias)[None]
    assert res.shape == (1, B, LATENT_DIM)
    assert jnp.allclose(res, ref, atol=1e-4, rtol=1e-4)

    print("KERNEL_OK")
</pallas_src>

<mosaic_0001>
module attributes {stable_mosaic.version = 11 : i64} {
  func.func @_hand_shape_kernel(%arg0: i32, %arg1: i32, %arg2: memref<2x128xf32, #tpu.memory_space<vmem>>, %arg3: memref<128x128xf32, #tpu.memory_space<vmem>>, %arg4: memref<1x128xf32, #tpu.memory_space<vmem>>, %arg5: memref<2x128xf32, #tpu.memory_space<vmem>>, %arg6: memref<2x128xf32, #tpu.memory_space<vmem>>) attributes {dimension_semantics = [#tpu.dimension_semantics<parallel>, #tpu.dimension_semantics<arbitrary>], iteration_bounds = array<i64: 1, 1>, scalar_prefetch = 0 : i64, scratch_operands = 1 : i64, tpu.core_type = #tpu.core_type<tc>, window_params = [{transform_indices = @transform_0, window_bounds = array<i64: 2, 128>}, {transform_indices = @transform_1, window_bounds = array<i64: 128, 128>}, {pipeline_mode = #tpu.pipeline_mode<synchronous>, transform_indices = @transform_2, window_bounds = array<i64: 1, 128>}, {transform_indices = @transform_3, window_bounds = array<i64: 2, 128>}]} {
    %c0_i32 = arith.constant 0 : i32
    %0 = arith.cmpi eq, %arg1, %c0_i32 : i32
    %1 = arith.extui %0 : i1 to i32
    %c0_i32_0 = arith.constant 0 : i32
    %2 = arith.cmpi ne, %1, %c0_i32_0 : i32
    scf.if %2 {
      %cst_10 = arith.constant 0.000000e+00 : f32
      %12 = vector.broadcast %cst_10 : f32 to vector<2x128xf32>
      %c0_11 = arith.constant 0 : index
      %c0_12 = arith.constant 0 : index
      %13 = vector.load %arg6[%c0_11, %c0_12] : memref<2x128xf32, #tpu.memory_space<vmem>>, vector<2x128xf32>
      tpu.vector_store %arg6[%c0_11, %c0_12], %12 {strides = array<i32>} : memref<2x128xf32, #tpu.memory_space<vmem>>, vector<2x128xf32>,
    } else {
    }
    %c0 = arith.constant 0 : index
    %c0_1 = arith.constant 0 : index
    %3 = vector.load %arg6[%c0, %c0_1] : memref<2x128xf32, #tpu.memory_space<vmem>>, vector<2x128xf32>
    %c0_2 = arith.constant 0 : index
    %c0_3 = arith.constant 0 : index
    %4 = vector.load %arg2[%c0_2, %c0_3] : memref<2x128xf32, #tpu.memory_space<vmem>>, vector<2x128xf32>
    %c0_4 = arith.constant 0 : index
    %c0_5 = arith.constant 0 : index
    %5 = vector.load %arg3[%c0_4, %c0_5] : memref<128x128xf32, #tpu.memory_space<vmem>>, vector<128x128xf32>
    %cst = arith.constant dense<0.000000e+00> : vector<2x128xf32>
    %6 = tpu.matmul %4, %5, %cst {dimension_numbers = #tpu.dot_dimension_numbers<[1], [0], [0], [1], [0, 0, 1, 1], [], []>} : vector<2x128xf32>, vector<128x128xf32>, vector<2x128xf32> -> vector<2x128xf32>
    %7 = arith.addf %3, %6 : vector<2x128xf32>
    %c0_6 = arith.constant 0 : index
    %c0_7 = arith.constant 0 : index
    %8 = vector.load %arg6[%c0_6, %c0_7] : memref<2x128xf32, #tpu.memory_space<vmem>>, vector<2x128xf32>
    tpu.vector_store %arg6[%c0_6, %c0_7], %7 {strides = array<i32>} : memref<2x128xf32, #tpu.memory_space<vmem>>, vector<2x128xf32>,
    %c0_i32_8 = arith.constant 0 : i32
    %9 = arith.cmpi eq, %arg1, %c0_i32_8 : i32
    %10 = arith.extui %9 : i1 to i32
    %c0_i32_9 = arith.constant 0 : i32
    %11 = arith.cmpi ne, %10, %c0_i32_9 : i32
    scf.if %11 {
      %c0_10 = arith.constant 0 : index
      %c0_11 = arith.constant 0 : index
      %12 = vector.load %arg6[%c0_10, %c0_11] : memref<2x128xf32, #tpu.memory_space<vmem>>, vector<2x128xf32>
      %c0_12 = arith.constant 0 : index
      %c0_13 = arith.constant 0 : index
      %13 = vector.load %arg4[%c0_12, %c0_13] : memref<1x128xf32, #tpu.memory_space<vmem>>, vector<1x128xf32>
      %14 = vector.broadcast %13 : vector<1x128xf32> to vector<2x128xf32>
      %15 = arith.addf %12, %14 : vector<2x128xf32>
      %c0_14 = arith.constant 0 : index
      %c0_15 = arith.constant 0 : index
      %16 = vector.load %arg5[%c0_14, %c0_15] : memref<2x128xf32, #tpu.memory_space<vmem>>, vector<2x128xf32>
      tpu.vector_store %arg5[%c0_14, %c0_15], %15 {strides = array<i32>} : memref<2x128xf32, #tpu.memory_space<vmem>>, vector<2x128xf32>,
    } else {
    }
    return
  }
  func.func @transform_0(%arg0: i32, %arg1: i32) -> (i32, i32) {
    %c0_i32 = arith.constant 0 : i32
    return %arg0, %arg1 : i32, i32
  }
  func.func @transform_1(%arg0: i32, %arg1: i32) -> (i32, i32) {
    %c0_i32 = arith.constant 0 : i32
    %c0_i32_0 = arith.constant 0 : i32
    return %arg1, %c0_i32 : i32, i32
  }
  func.func @transform_2(%arg0: i32, %arg1: i32) -> (i32, i32) {
    %c0_i32 = arith.constant 0 : i32
    %c0_i32_0 = arith.constant 0 : i32
    %c0_i32_1 = arith.constant 0 : i32
    return %c0_i32, %c0_i32_0 : i32, i32
  }
  func.func @transform_3(%arg0: i32, %arg1: i32) -> (i32, i32) {
    %c0_i32 = arith.constant 0 : i32
    %c0_i32_0 = arith.constant 0 : i32
    return %arg0, %c0_i32 : i32, i32
  }
}

</mosaic_0001>

<bundles_post_ra>
// kernel: tpu_custom_call.1
= control target key start
LH: loop header
LB: loop body
LE: loop exit
PB: predicated region body
PF: predicated region fallthrough
CT: control target
= control target key end

     0   :  { %8 = vsyncpa [#allocation4], 0  ;;  %s433_s0 = inlined_call_operand.hbm [shape: f32[2,128], index: 0, kind: input, shape index: {}]   ;;  %s434_s1 = inlined_call_operand.hbm [shape: f32[128,128], index: 1, kind: input, shape index: {}]   ;;  %s435_s2 = inlined_call_operand.hbm [shape: f32[1,128], index: 2, kind: input, shape index: {}]   ;;  %s436_s3 = inlined_call_operand.hbm [shape: f32[2,128], index: 3, kind: output, shape index: {}]  }
   0x1   :  { %9 = vsyncpa [#allocation7], 0 }
   0x2   :  { %10 = vsyncpa [#allocation5], 0  ;;  %s356_s12 = smov [#allocation6]   ;;  %s262_s16 = scalar_lea.hbm %s434_s1, 2048 }
   0x3   :  { %s26_s13 = sshll.u32 %s356_s12, 4  ;;  %p263_p0 = scmp.ne.s32.totalorder %s434_s1, %s262_s16  ;;  %s27_s13 = int_to_ptr.vmem [resolvable:$true] %s26_s13 }
   0x4   :  { %p266_p1 = scmp.lt.u32.totalorder %s262_s16, %s434_s1 }
   0x6   :  { %p268_p2 = pnand %p266_p1, %p263_p0 }
   0x8   :  { %271 = shalt.err (!%p268_p2)
}
   0x9   :  { %s272_s21 = scalar_lea.vmem %s27_s13, 2048  ;;  %p277_p4 = scmp.lt.s32.totalorder %s27_s13, %s27_s13 }
   0xa   :  { %p273_p3 = scmp.ne.s32.totalorder %s27_s13, %s272_s21  ;;  %p278_p5 = scmp.lt.s32.totalorder %s272_s21, %s272_s21 }
   0xc   :  { %p279_p6 = por %p278_p5, %p277_p4 }
   0xe   :  { %p280_p7 = pnand %p279_p6, %p273_p3 }
  0x10   :  { %283 = shalt.err (!%p280_p7)
}
  0x11   :  { %s357_s22 = smov 128   ;;  %s358_s23 = smov 8  }
  0x12   :  { %32 = dma.hbm_to_vmem [thread:$0]  %s434_s1, 2048, %s27_s13, [#allocation7], %s357_s22, %s357_s22, %s358_s23  }
  0x13   :  { %s359_s26 = smov [#allocation3]   ;;  %s360_s28 = smov [#allocation8]  }
  0x14   :  { %s17_s27 = sshll.u32 %s359_s26, 4  ;;  %s39_s29 = sshll.u32 %s360_s28, 4  ;;  %s18_s27 = int_to_ptr.vmem [resolvable:$true] %s17_s27  ;;  %s40_s29 = int_to_ptr.vmem [resolvable:$true] %s39_s29 }
  0x15   :  { %s284_s5 = scalar_lea.hbm %s433_s0, 32 }
  0x16   :  { %p285_p8 = scmp.ne.s32.totalorder %s433_s0, %s284_s5  ;;  %p288_p9 = scmp.lt.u32.totalorder %s284_s5, %s433_s0 }
  0x18   :  { %p290_p10 = pnand %p288_p9, %p285_p8 }
  0x1a   :  { %293 = shalt.err (!%p290_p10)
}
  0x1b   :  { %s294_s1 = scalar_lea.vmem %s18_s27, 32  ;;  %p299_p12 = scmp.lt.s32.totalorder %s18_s27, %s18_s27 }
  0x1c   :  { %p295_p11 = scmp.ne.s32.totalorder %s18_s27, %s294_s1  ;;  %p300_p13 = scmp.lt.s32.totalorder %s294_s1, %s294_s1 }
  0x1e   :  { %p301_p0 = por %p300_p13, %p299_p12 }
  0x20   :  { %p302_p1 = pnand %p301_p0, %p295_p11 }
  0x22   :  { %305 = shalt.err (!%p302_p1)
}
  0x23   :  { %20 = dma.hbm_to_vmem [thread:$0]  %s433_s0, 32, %s18_s27, [#allocation4]  }
  0x24   :  { %s306_s14 = scalar_lea.hbm %s435_s2, 16 }
  0x25   :  { %p307_p2 = scmp.ne.s32.totalorder %s435_s2, %s306_s14  ;;  %p310_p3 = scmp.lt.u32.totalorder %s306_s14, %s435_s2 }
  0x27   :  { %p312_p4 = pnand %p310_p3, %p307_p2 }
  0x29   :  { %315 = shalt.err (!%p312_p4)
}
  0x2a   :  { %s316_s19 = scalar_lea.vmem %s40_s29, 16  ;;  %s320_s20 = scalar_lea.vmem %s40_s29, 32 }
  0x2b   :  { %p317_p5 = scmp.ne.s32.totalorder %s40_s29, %s316_s19  ;;  %p321_p6 = scmp.lt.s32.totalorder %s40_s29, %s40_s29 }
  0x2c   :  { %p322_p7 = scmp.lt.s32.totalorder %s320_s20, %s316_s19 }
  0x2e   :  { %p323_p8 = por %p322_p7, %p321_p6 }
  0x30   :  { %p324_p9 = pnand %p323_p8, %p317_p5 }
  0x32   :  { %327 = shalt.err (!%p324_p9)
}
  0x33   :  { %42 = dma.hbm_to_vmem [thread:$0]  %s435_s2, 16, %s40_s29, [#allocation7]  }
  0x34   :  { %350 = dma.done.wait [#allocation4], 32  }
  0x35   :  { %351 = vsyncadd [#allocation4], 4294967264 }
  0x36   :  { %352 = dma.done.wait [#allocation7], 2064  }
  0x37   :  { %353 = vsyncadd [#allocation7], 4294965232  ;;  %v361_v0 = vmov 0.0|0.0   ;;  %v362_v1 = vmov 0.0   ;;  %vm363_vm0 = vmmov 0   ;;  %v59_v2 = vld [vmem:[#allocation6] sm:$0xff] }
  0x38   :  { %229 = vmatprep.subr.bf16.mxu0 %v361_v0  ;;  %56 = vst [vmem:[#allocation2] sm:$0x3] %v362_v1  ;;  %226 = vmatprep.mubr.msk.f32.mxu0 %vm363_vm0, %v362_v1  ;;  %v60_v3 = vld [vmem:[#allocation6 + $0x8] sm:$0xff]  ;;  %v61_v4 = vld [vmem:[#allocation6 + $0x10] sm:$0xff]  ;;  %v62_v6 = vld [vmem:[#allocation6 + $0x18] sm:$0xff]  ;;  %s364_s2 = smov [#allocation9]  }
  0x39   :  { %v230_v5 = vpack.c.bf16 %v60_v3, %v59_v2  ;;  %v233_v7 = vpack.c.bf16 %v62_v6, %v61_v4  ;;  %v63_v8 = vld [vmem:[#allocation6 + $0x20] sm:$0xff]  ;;  %v64_v9 = vld [vmem:[#allocation6 + $0x28] sm:$0xff]  ;;  %v65_v11 = vld [vmem:[#allocation6 + $0x30] sm:$0xff]  ;;  %s166_s22 = sshll.u32 %s364_s2, 4  ;;  %s167_s22 = int_to_ptr.vmem [resolvable:$true] %s166_s22 }
  0x3a   :  { %v236_v10 = vpack.c.bf16 %v64_v9, %v63_v8  ;;  %v66_v12 = vld [vmem:[#allocation6 + $0x38] sm:$0xff]  ;;  %v67_v14 = vld [vmem:[#allocation6 + $0x40] sm:$0xff]  ;;  %v68_v15 = vld [vmem:[#allocation6 + $0x48] sm:$0xff]  ;;  %s328_s23 = scalar_lea.vmem %s167_s22, 32  ;;  %p333_p11 = scmp.lt.s32.totalorder %s167_s22, %s167_s22 }
  0x3b   :  { %231 = vmatpush3.bf16.msra.mxu0 %v230_v5  ;;  %v239_v13 = vpack.c.bf16 %v66_v12, %v65_v11  ;;  %v242_v16 = vpack.c.bf16 %v68_v15, %v67_v14  ;;  %v69_v17 = vld [vmem:[#allocation6 + $0x50] sm:$0xff]  ;;  %v70_v18 = vld [vmem:[#allocation6 + $0x58] sm:$0xff]  ;;  %v71_v20 = vld [vmem:[#allocation6 + $0x60] sm:$0xff]  ;;  %p329_p10 = scmp.ne.s32.totalorder %s167_s22, %s328_s23  ;;  %p334_p12 = scmp.lt.s32.totalorder %s328_s23, %s328_s23 }
  0x3c   :  { %232 = vmatprep.subr.bf16.mxu0 %v361_v0  ;;  %v245_v19 = vpack.c.bf16 %v70_v18, %v69_v17  ;;  %v72_v21 = vld [vmem:[#allocation6 + $0x68] sm:$0xff]  ;;  %v73_v23 = vld [vmem:[#allocation6 + $0x70] sm:$0xff]  ;;  %v74_v24 = vld [vmem:[#allocation6 + $0x78] sm:$0xff] }
  0x3d   :  { %v248_v22 = vpack.c.bf16 %v72_v21, %v71_v20  ;;  %v251_v25 = vpack.c.bf16 %v74_v24, %v73_v23  ;;  %v58_v26 = vld [vmem:[#allocation3] sm:$0x3]  ;;  %v176_v31 = vld [vmem:[#allocation8] ss:$0 sm:$0xff]  ;;  %p335_p13 = por %p334_p12, %p333_p11 }
  0x3f   :  { %234 = vmatpush3.bf16.msra.mxu0 %v233_v7  ;;  %v57_v27 = vld [vmem:[#allocation2] sm:$0x3]  ;;  %p336_p0 = pnand %p335_p13, %p329_p10 }
  0x40   :  { %235 = vmatprep.subr.bf16.mxu0 %v361_v0 }
  0x43   :  { %237 = vmatpush3.bf16.msra.mxu0 %v236_v10 }
  0x44   :  { %238 = vmatprep.subr.bf16.mxu0 %v361_v0 }
  0x47   :  { %240 = vmatpush3.bf16.msra.mxu0 %v239_v13 }
  0x48   :  { %241 = vmatprep.subr.bf16.mxu0 %v361_v0 }
  0x4b   :  { %243 = vmatpush3.bf16.msra.mxu0 %v242_v16 }
  0x4c   :  { %244 = vmatprep.subr.bf16.mxu0 %v361_v0 }
  0x4f   :  { %246 = vmatpush3.bf16.msra.mxu0 %v245_v19 }
  0x50   :  { %247 = vmatprep.subr.bf16.mxu0 %v361_v0 }
  0x53   :  { %249 = vmatpush3.bf16.msra.mxu0 %v248_v22 }
  0x54   :  { %250 = vmatprep.subr.bf16.mxu0 %v361_v0 }
  0x57   :  { %252 = vmatpush3.bf16.msra.mxu0 %v251_v25 }
  0x5a   :  { %227 = vmatmul.mubr.f32.vlgmr.msra.gmra.mrb[0].mxu0 %v58_v26 }
 0x12d   :  { %v141_v28 = vpop.f32.mrb[0].mxu0 }
 0x12e   :  { %v145_v29 = vadd.f32 %v141_v28, %v57_v27  ;;  %v228_v30 = vpop.f32.mrb[1].mxu0 }
 0x130   :  { %146 = vst [vmem:[#allocation2] sm:$0x3] %v145_v29 }
 0x137   :  { %v150_v32 = vld [vmem:[#allocation2] sm:$0x3] }
 0x138   :  { %v158_v33 = vadd.f32 %v176_v31, %v150_v32 }
 0x13a   :  { %159 = vst [vmem:[#allocation9] sm:$0x3] %v158_v33 }
 0x13b   :  { %339 = shalt.err (!%p336_p0)
}
 0x13c   :  { %s340_s26 = scalar_lea.hbm %s436_s3, 32 }
 0x13d   :  { %p341_p1 = scmp.ne.s32.totalorder %s436_s3, %s340_s26  ;;  %p344_p2 = scmp.lt.u32.totalorder %s340_s26, %s436_s3 }
 0x13f   :  { %p346_p3 = pnand %p344_p2, %p341_p1 }
 0x141   :  { %349 = shalt.err (!%p346_p3)
}
 0x142   :  { %169 = dma.vmem_to_hbm [thread:$0]  %s167_s22, 32, %s436_s3, [#allocation5]  }
 0x143   :  { %354 = dma.done.wait [#allocation5], 32  }
 0x144   :  { %355 = vsyncadd [#allocation5], 4294967264 }
 0x145   :  { %173 = vsyncpa [#allocation4], 1 }
 0x146   :  { %174 = vsyncpa [#allocation7], 1 }
 0x147   :  { %175 = vsyncpa [#allocation5], 1 }

</bundles_post_ra>
